<compile_context>
chip_gen: v5e
topology: v5e:2x2
jax: 0.10.0
libtpu: 0.0.40
codegen_flags: <defaults>
</compile_context>

<pallas_src>
import math

import jax
import jax.numpy as jnp
from jax.experimental import pallas as pl
from jax.experimental.pallas import tpu as pltpu


# ---------------------------------------------------------------------------
# Kernel factory: one block of `bblk` batches per grid step.
# ---------------------------------------------------------------------------
def _make_past_encoder_kernel(bblk, n_pad, n_real, d):
    def kernel(x_ref, wf_ref, const_ref, ftraj_ref, corr_ref):
        # x_ref:     (bblk*n_pad, K)  all agent-rows of this block, lane-dense
        # wf_ref:    (K, D)           folded affine weight (shared, not broadcast)
        # const_ref: (n_pad, D)       per-agent constant (biases + pos-enc + id-cat)
        # Single 2-D MXU matmul for the whole block (bblk*n_pad rows, K deep).
        f3_2d = jnp.dot(x_ref[...], wf_ref[...],
                        preferred_element_type=jnp.float32)        # (bblk*n_pad, D)
        f3 = f3_2d.reshape(bblk, n_pad, d) + const_ref[...][None, :, :]
        ftraj_ref[...] = f3                                         # (bblk, n_pad, D)

        # F.normalize(p=2, dim=-1): x / max(||x||, 1e-12) == x * rsqrt(max(ss, 1e-24))
        sumsq = jnp.sum(f3 * f3, axis=-1, keepdims=True)
        q = f3 * jax.lax.rsqrt(jnp.maximum(sumsq, 1e-24))

        # feat_corr = q @ q^T   (batched gram over the bblk batches in this block)
        corr = jnp.einsum("bnd,bmd->bnm", q, q,
                          preferred_element_type=jnp.float32)       # (bblk, n_pad, n_pad)

        # Per-batch data-dependent threshold.  Padded agents (>= n_real) must
        # not contaminate the per-batch min, so mask them to +inf for the min.
        row = jax.lax.broadcasted_iota(jnp.int32, (1, n_pad, n_pad), 1)
        col = jax.lax.broadcasted_iota(jnp.int32, (1, n_pad, n_pad), 2)
        valid = (row < n_real) & (col < n_real)
        corr_for_min = jnp.where(valid, corr, jnp.float32(jnp.inf))
        a = jnp.min(jnp.min(corr_for_min, axis=2, keepdims=True),
                    axis=1, keepdims=True)
        # a == 0.4 exactly falls into the `a + 0.03` branch, same as the
        # python if/elif/else chain in the module.
        th = jnp.where(a < 0.4, jnp.float32(0.4),
                       jnp.where((a > 0.4) & (a < 0.6), a + 0.1, a + 0.03))
        corr_ref[...] = jnp.where(corr < th, 0.0, corr)

    return kernel


# ---------------------------------------------------------------------------
# Affine-chain fold (done once, outside the kernel, in f32):
# input_fc -> pos_encoder.fc -> input_fc2 -> add_category + input_fc3
# collapses to   f3 = x @ W_fold + const   with x = (N, T*in_dim).
# ---------------------------------------------------------------------------
def _fold_affine(params, T, Din, D):
    w1 = params["w1"]                      # (Din, D)
    b1 = params["b1"][0]                   # (D,)
    wpx = params["wpos_x"]                 # (D, D)   x-half of pos fc weight
    wpp = params["wpos_pe"]                # (D, D)   pe-half of pos fc weight
    bp = params["bpos"][0]                 # (D,)
    w2 = params["w2"]                      # (T, D, D)  == fc2 weight (T*D, D)
    b2 = params["b2"][0]                   # (D,)
    w3x = params["w3_x"]                   # (D, D)   feature half of fc3 weight
    w3c = params["w3_cat"]                 # (N, D)   category (identity) half
    b3 = params["b3"][0]                   # (D,)
    pe = params["pe"]                      # (T, D)

    a1 = w1 @ wpx                                          # (Din, D)
    wf = jnp.einsum("id,tde->tie", a1, w2)                 # (T, Din, D)
    wf = wf.reshape(T * Din, D) @ w3x                      # (T*Din, D)

    bias_t = b1 @ wpx + pe @ wpp + bp                      # (T, D)
    c = jnp.einsum("td,tde->e", bias_t, w2) + b2           # (D,)
    const = (c @ w3x)[None, :] + w3c + b3[None, :]         # (N, D)
    return wf, const


def _choose_batch_block(batch_size, n_pad, k, d, vmem_budget_bytes=24 << 20):
    """Single grid step unless each v7x TensorCore would carry >= ~512 matmul
    rows; bblk otherwise only capped by the scoped-VMEM budget."""
    # per-batch block footprint (f32, double-buffered x + ftraj + corr)
    per_batch_bytes = 4 * 2 * (n_pad * k + n_pad * d + n_pad * n_pad)
    max_bblk = max(1, vmem_budget_bytes // per_batch_bytes)
    if batch_size * n_pad >= 1024:          # enough rows to feed both v7x TCs
        bblk = (batch_size + 1) // 2
    else:
        bblk = batch_size                   # one step (v5e/v6e are 1 TC/chip)
    return max(1, min(bblk, max_bblk))


def past_encoder_forward(inputs, params, batch_size, agent_num,
                         *, use_bf16_matmul=False):
    """inputs: (batch_size*agent_num, T, in_dim) — same as the PyTorch module."""
    BN, T, Din = inputs.shape
    assert BN == batch_size * agent_num
    D = params["w1"].shape[1]
    K = T * Din
    # Sublane-align the agent axis (11 -> 16) so the per-block batched matmul
    # collapses to one 2-D MXU matmul without crossing (8,128) tile lines.
    n_pad = max(8, -(-agent_num // 8) * 8)

    # batch-independent precompute (done once, outside the kernel, f32)
    wf, const = _fold_affine(params, T, Din, D)
    const_p = jnp.zeros((n_pad, D), jnp.float32).at[:agent_num].set(const)

    bblk = _choose_batch_block(batch_size, n_pad, K, D)
    num_blocks = (batch_size + bblk - 1) // bblk
    b_pad = num_blocks * bblk

    # lane-dense operand layout: (B, n_pad, T*in_dim), zero-padded, then
    # collapsed to 2-D so the kernel issues a single jnp.dot per block.
    x3 = inputs.reshape(batch_size, agent_num, K)
    x3 = jnp.pad(x3, ((0, b_pad - batch_size), (0, n_pad - agent_num), (0, 0)))
    x2 = x3.reshape(b_pad * n_pad, K)

    if use_bf16_matmul:
        # Halves input DMA bytes + native bf16 MXU path (v6e/v7x).  Corr
        # entries near the data-dependent threshold may flip vs f32 — only
        # enable after re-validating downstream consumers.
        x2 = x2.astype(jnp.bfloat16)
        wf = wf.astype(jnp.bfloat16)

    kernel = _make_past_encoder_kernel(bblk, n_pad, agent_num, D)

    ftraj, corr = pl.pallas_call(
        kernel,
        out_shape=(
            jax.ShapeDtypeStruct((b_pad, n_pad, D), jnp.float32),
            jax.ShapeDtypeStruct((b_pad, n_pad, n_pad), jnp.float32),
        ),
        grid_spec=pltpu.PrefetchScalarGridSpec(
            num_scalar_prefetch=0,
            grid=(num_blocks,),
            in_specs=[
                pl.BlockSpec((bblk * n_pad, K), lambda i: (i, 0)),   # x rows
                pl.BlockSpec((K, D), lambda i: (0, 0)),              # W_fold (shared)
                pl.BlockSpec((n_pad, D), lambda i: (0, 0)),          # const (shared)
            ],
            out_specs=[
                pl.BlockSpec((bblk, n_pad, D), lambda i: (i, 0, 0)),
                pl.BlockSpec((bblk, n_pad, n_pad), lambda i: (i, 0, 0)),
            ],
        ),
        compiler_params=pltpu.CompilerParams(
            dimension_semantics=("parallel",)),
    )(x2, wf, const_p)

    # TODO(synk): MS_HGNN_oridinary / MS_HGNN_hyper* (class defs not provided)
    # and divide_group_adap/group_complete (host-side networkx clique
    # enumeration + freshly-initialized line_embedding weights) have no clean
    # Pallas equivalent; the kernel returns ftraj_input and the thresholded
    # feat_corr that feed those stages.
    return (ftraj[:batch_size, :agent_num, :],
            corr[:batch_size, :agent_num, :agent_num])


# ---------------------------------------------------------------------------
# Helpers + pure-JAX reference (mirrors the PyTorch forward, un-folded).
# ---------------------------------------------------------------------------
def build_pos_enc(max_len, d_model):
    position = jnp.arange(max_len, dtype=jnp.float32)[:, None]
    div_term = jnp.exp(jnp.arange(0, d_model, 2, dtype=jnp.float32)
                       * (-math.log(10000.0) / d_model))
    pe = jnp.zeros((max_len, d_model), jnp.float32)
    pe = pe.at[:, 0::2].set(jnp.sin(position * div_term))
    pe = pe.at[:, 1::2].set(jnp.cos(position * div_term))
    return pe


def reference_forward(inputs, params, batch_size, agent_num):
    BN, T, Din = inputs.shape
    D = params["w1"].shape[1]
    tf_in = inputs @ params["w1"] + params["b1"][0]
    pos = jnp.broadcast_to(params["pe"][None], (BN, T, D))
    cat = jnp.concatenate([tf_in, pos], axis=-1)
    wpos = jnp.concatenate([params["wpos_x"], params["wpos_pe"]], axis=0)
    tf_pos = cat @ wpos + params["bpos"][0]
    w2_flat = params["w2"].reshape(T * D, D)
    ftraj = (tf_pos.reshape(batch_size, agent_num, T * D) @ w2_flat
             + params["b2"][0])
    eye = jnp.broadcast_to(jnp.eye(agent_num, dtype=jnp.float32),
                           (batch_size, agent_num, agent_num))
    w3 = jnp.concatenate([params["w3_x"], params["w3_cat"]], axis=0)
    f3 = jnp.concatenate([ftraj, eye], axis=-1) @ w3 + params["b3"][0]
    nrm = jnp.sqrt(jnp.sum(f3 * f3, axis=-1, keepdims=True))
    q = f3 / jnp.maximum(nrm, 1e-12)
    corr = jnp.einsum("bnd,bmd->bnm", q, q)

    def thr(c):
        a = jnp.min(c)
        t = jnp.where(a < 0.4, 0.4,
                      jnp.where((a > 0.4) & (a < 0.6), a + 0.1, a + 0.03))
        return jnp.where(c < t, 0.0, c)

    return f3, jax.vmap(thr)(corr)


if __name__ == "__main__":
    # agent_num must be 11 (categ=11 hard-coded in the module); small dims.
    B, N, T, Din, D = 2, 11, 8, 4, 32   # batch, agents, past_length, in_dim, hidden_dim

    key = jax.random.PRNGKey(0)
    ks = jax.random.split(key, 12)

    def lin(kk, fan_in, shape):
        bound = 1.0 / math.sqrt(fan_in)
        return jax.random.uniform(kk, shape, jnp.float32, -bound, bound)

    params = {
        "w1":      lin(ks[0], Din,     (Din, D)),
        "b1":      lin(ks[1], Din,     (1, D)),
        "wpos_x":  lin(ks[2], 2 * D,   (D, D)),
        "wpos_pe": lin(ks[3], 2 * D,   (D, D)),
        "bpos":    lin(ks[4], 2 * D,   (1, D)),
        "w2":      lin(ks[5], T * D,   (T, D, D)),
        "b2":      lin(ks[6], T * D,   (1, D)),
        "w3_x":    lin(ks[7], D + N,   (D, D)),
        "w3_cat":  lin(ks[8], D + N,   (N, D)),
        "b3":      lin(ks[9], D + N,   (1, D)),
        "pe":      build_pos_enc(T, D),
    }

    inputs = jax.random.normal(ks[10], (B * N, T, Din), jnp.float32)

    ftraj, corr = past_encoder_forward(inputs, params, B, N)
    jax.block_until_ready((ftraj, corr))

    rf, rc = reference_forward(inputs, params, B, N)
    assert jnp.allclose(ftraj, rf, atol=1e-3, rtol=1e-3), "ftraj mismatch"
    assert jnp.allclose(corr, rc, atol=1e-3, rtol=1e-3), "feat_corr mismatch"

    print("KERNEL_OK")
</pallas_src>

<mosaic_0001>
module attributes {stable_mosaic.version = 11 : i64} {
  func.func @kernel(%arg0: i32, %arg1: memref<32x32xf32, #tpu.memory_space<vmem>>, %arg2: memref<32x32xf32, #tpu.memory_space<vmem>>, %arg3: memref<16x32xf32, #tpu.memory_space<vmem>>, %arg4: memref<2x16x32xf32, #tpu.memory_space<vmem>>, %arg5: memref<2x16x16xf32, #tpu.memory_space<vmem>>) attributes {dimension_semantics = [#tpu.dimension_semantics<parallel>], iteration_bounds = array<i64: 1>, scalar_prefetch = 0 : i64, scratch_operands = 0 : i64, tpu.core_type = #tpu.core_type<tc>, window_params = [{transform_indices = @transform_0, window_bounds = array<i64: 32, 32>}, {pipeline_mode = #tpu.pipeline_mode<synchronous>, transform_indices = @transform_1, window_bounds = array<i64: 32, 32>}, {pipeline_mode = #tpu.pipeline_mode<synchronous>, transform_indices = @transform_2, window_bounds = array<i64: 16, 32>}, {transform_indices = @transform_3, window_bounds = array<i64: 2, 16, 32>}, {transform_indices = @transform_4, window_bounds = array<i64: 2, 16, 16>}]} {
    %c0 = arith.constant 0 : index
    %c0_0 = arith.constant 0 : index
    %0 = vector.load %arg1[%c0, %c0_0] : memref<32x32xf32, #tpu.memory_space<vmem>>, vector<32x32xf32>
    %c0_1 = arith.constant 0 : index
    %c0_2 = arith.constant 0 : index
    %1 = vector.load %arg2[%c0_1, %c0_2] : memref<32x32xf32, #tpu.memory_space<vmem>>, vector<32x32xf32>
    %cst = arith.constant dense<0.000000e+00> : vector<32x32xf32>
    %2 = tpu.matmul %0, %1, %cst {dimension_numbers = #tpu.dot_dimension_numbers<[1], [0], [0], [1], [0, 0, 1, 1], [], []>} : vector<32x32xf32>, vector<32x32xf32>, vector<32x32xf32> -> vector<32x32xf32>
    %3 = vector.shape_cast %2 : vector<32x32xf32> to vector<2x16x32xf32>
    %c0_3 = arith.constant 0 : index
    %c0_4 = arith.constant 0 : index
    %4 = vector.load %arg3[%c0_3, %c0_4] : memref<16x32xf32, #tpu.memory_space<vmem>>, vector<16x32xf32>
    %5 = vector.shape_cast %4 : vector<16x32xf32> to vector<1x16x32xf32>
    %6 = vector.broadcast %5 : vector<1x16x32xf32> to vector<2x16x32xf32>
    %7 = arith.addf %3, %6 : vector<2x16x32xf32>
    %c0_5 = arith.constant 0 : index
    %c0_6 = arith.constant 0 : index
    %c0_7 = arith.constant 0 : index
    %8 = vector.load %arg4[%c0_5, %c0_6, %c0_7] : memref<2x16x32xf32, #tpu.memory_space<vmem>>, vector<2x16x32xf32>
    tpu.vector_store %arg4[%c0_5, %c0_6, %c0_7], %7 {strides = array<i32>} : memref<2x16x32xf32, #tpu.memory_space<vmem>>, vector<2x16x32xf32>,
    %9 = arith.mulf %7, %7 : vector<2x16x32xf32>
    %cst_8 = arith.constant dense<0.000000e+00> : vector<2x16xf32>
    %10 = vector.multi_reduction <add>, %9, %cst_8 [2] : vector<2x16x32xf32> to vector<2x16xf32>
    %11 = vector.shape_cast %10 : vector<2x16xf32> to vector<2x16x1xf32>
    %cst_9 = arith.constant 1.000000e-24 : f32
    %12 = vector.broadcast %cst_9 : f32 to vector<2x16x1xf32>
    %13 = arith.maximumf %11, %12 : vector<2x16x1xf32>
    %14 = math.rsqrt %13 : vector<2x16x1xf32>
    %15 = vector.broadcast %14 : vector<2x16x1xf32> to vector<2x16x32xf32>
    %16 = arith.mulf %7, %15 : vector<2x16x32xf32>
    "tpu.trace_start"() <{level = 10 : i32, message = "bnd,bmd->bnm"}> : () -> ()
    %cst_10 = arith.constant dense<0.000000e+00> : vector<2x16x16xf32>
    %17 = tpu.matmul %16, %16, %cst_10 {dimension_numbers = #tpu.dot_dimension_numbers<[2], [2], [1], [1], [0, 0, 0, 1, 1, 1], [0], [0]>} : vector<2x16x32xf32>, vector<2x16x32xf32>, vector<2x16x16xf32> -> vector<2x16x16xf32>
    "tpu.trace_stop"() : () -> ()
    %18 = tpu.iota {dimensions = array<i32: 1>} : vector<1x16x16xi32>
    %19 = tpu.iota {dimensions = array<i32: 2>} : vector<1x16x16xi32>
    %c11_i32 = arith.constant 11 : i32
    %20 = vector.broadcast %c11_i32 : i32 to vector<1x16x16xi32>
    %21 = arith.cmpi slt, %18, %20 : vector<1x16x16xi32>
    %c11_i32_11 = arith.constant 11 : i32
    %22 = vector.broadcast %c11_i32_11 : i32 to vector<1x16x16xi32>
    %23 = arith.cmpi slt, %19, %22 : vector<1x16x16xi32>
    %24 = arith.andi %21, %23 : vector<1x16x16xi1>
    %cst_12 = arith.constant 0x7F800000 : f32
    %25 = vector.shape_cast %24 : vector<1x16x16xi1> to vector<1x16x16xi1>
    %26 = vector.broadcast %25 : vector<1x16x16xi1> to vector<2x16x16xi1>
    %27 = vector.broadcast %cst_12 : f32 to vector<2x16x16xf32>
    %28 = arith.select %26, %17, %27 : vector<2x16x16xi1>, vector<2x16x16xf32>
    %cst_13 = arith.constant dense<0x7F800000> : vector<2x16xf32>
    %29 = vector.multi_reduction <minimumf>, %28, %cst_13 [2] : vector<2x16x16xf32> to vector<2x16xf32>
    %30 = vector.shape_cast %29 : vector<2x16xf32> to vector<2x16x1xf32>
    %cst_14 = arith.constant dense<0x7F800000> : vector<2x1xf32>
    %31 = vector.multi_reduction <minimumf>, %30, %cst_14 [1] : vector<2x16x1xf32> to vector<2x1xf32>
    %32 = vector.shape_cast %31 : vector<2x1xf32> to vector<2x1x1xf32>
    %cst_15 = arith.constant 4.000000e-01 : f32
    %33 = vector.broadcast %cst_15 : f32 to vector<2x1x1xf32>
    %34 = arith.cmpf olt, %32, %33 : vector<2x1x1xf32>
    %cst_16 = arith.constant 4.000000e-01 : f32
    %35 = vector.broadcast %cst_16 : f32 to vector<2x1x1xf32>
    %36 = arith.cmpf ogt, %32, %35 : vector<2x1x1xf32>
    %cst_17 = arith.constant 6.000000e-01 : f32
    %37 = vector.broadcast %cst_17 : f32 to vector<2x1x1xf32>
    %38 = arith.cmpf olt, %32, %37 : vector<2x1x1xf32>
    %39 = arith.andi %36, %38 : vector<2x1x1xi1>
    %cst_18 = arith.constant 1.000000e-01 : f32
    %40 = vector.broadcast %cst_18 : f32 to vector<2x1x1xf32>
    %41 = arith.addf %32, %40 : vector<2x1x1xf32>
    %cst_19 = arith.constant 3.000000e-02 : f32
    %42 = vector.broadcast %cst_19 : f32 to vector<2x1x1xf32>
    %43 = arith.addf %32, %42 : vector<2x1x1xf32>
    %44 = arith.select %39, %41, %43 : vector<2x1x1xi1>, vector<2x1x1xf32>
    %cst_20 = arith.constant 4.000000e-01 : f32
    %45 = vector.broadcast %cst_20 : f32 to vector<2x1x1xf32>
    %46 = arith.select %34, %45, %44 : vector<2x1x1xi1>, vector<2x1x1xf32>
    %47 = vector.broadcast %46 : vector<2x1x1xf32> to vector<2x16x16xf32>
    %48 = arith.cmpf olt, %17, %47 : vector<2x16x16xf32>
    %cst_21 = arith.constant 0.000000e+00 : f32
    %49 = vector.broadcast %cst_21 : f32 to vector<2x16x16xf32>
    %50 = arith.select %48, %49, %17 : vector<2x16x16xi1>, vector<2x16x16xf32>
    %c0_22 = arith.constant 0 : index
    %c0_23 = arith.constant 0 : index
    %c0_24 = arith.constant 0 : index
    %51 = vector.load %arg5[%c0_22, %c0_23, %c0_24] : memref<2x16x16xf32, #tpu.memory_space<vmem>>, vector<2x16x16xf32>
    tpu.vector_store %arg5[%c0_22, %c0_23, %c0_24], %50 {strides = array<i32>} : memref<2x16x16xf32, #tpu.memory_space<vmem>>, vector<2x16x16xf32>,
    return
  }
  func.func @transform_0(%arg0: i32) -> (i32, i32) {
    %c0_i32 = arith.constant 0 : i32
    %c0_i32_0 = arith.constant 0 : i32
    return %arg0, %c0_i32 : i32, i32
  }
  func.func @transform_1(%arg0: i32) -> (i32, i32) {
    %c0_i32 = arith.constant 0 : i32
    %c0_i32_0 = arith.constant 0 : i32
    %c0_i32_1 = arith.constant 0 : i32
    return %c0_i32, %c0_i32_0 : i32, i32
  }
  func.func @transform_2(%arg0: i32) -> (i32, i32) {
    %c0_i32 = arith.constant 0 : i32
    %c0_i32_0 = arith.constant 0 : i32
    %c0_i32_1 = arith.constant 0 : i32
    return %c0_i32, %c0_i32_0 : i32, i32
  }
  func.func @transform_3(%arg0: i32) -> (i32, i32, i32) {
    %c0_i32 = arith.constant 0 : i32
    %c0_i32_0 = arith.constant 0 : i32
    %c0_i32_1 = arith.constant 0 : i32
    return %arg0, %c0_i32, %c0_i32_0 : i32, i32, i32
  }
  func.func @transform_4(%arg0: i32) -> (i32, i32, i32) {
    %c0_i32 = arith.constant 0 : i32
    %c0_i32_0 = arith.constant 0 : i32
    %c0_i32_1 = arith.constant 0 : i32
    return %arg0, %c0_i32, %c0_i32_0 : i32, i32, i32
  }
}

</mosaic_0001>

<bundles_post_ra>
// kernel: tpu_custom_call.1
= control target key start
LH: loop header
LB: loop body
LE: loop exit
PB: predicated region body
PF: predicated region fallthrough
CT: control target
= control target key end

     0   :  { %10 = vsyncpa [#allocation3], 0  ;;  %s619_s0 = inlined_call_operand.hbm [shape: f32[32,32], index: 0, kind: input, shape index: {}]   ;;  %s620_s1 = inlined_call_operand.hbm [shape: f32[32,32], index: 1, kind: input, shape index: {}]   ;;  %s621_s2 = inlined_call_operand.hbm [shape: f32[16,32], index: 2, kind: input, shape index: {}]   ;;  %s622_s3 = inlined_call_operand.hbm [shape: f32[2,16,32], index: 3, kind: output, shape index: {0}]   ;;  %s623_s4 = inlined_call_operand.hbm [shape: f32[2,16,16], index: 4, kind: output, shape index: {1}]  }
   0x1   :  { %11 = vsyncpa [#allocation6], 0 }
   0x2   :  { %12 = vsyncpa [#allocation4], 0 }
   0x3   :  { %13 = vsyncpa [#allocation10], 0  ;;  %s31_s17 = sshll.u32 %s620_s1, 4  ;;  %s517_s18 = smov [#allocation5]   ;;  %s32_s17 = int_to_ptr.hbm [resolvable:$true] %s31_s17 }
   0x4   :  { %s33_s19 = sshll.u32 %s517_s18, 4  ;;  %s18_s22 = sshll.u32 %s619_s0, 4  ;;  %s34_s19 = int_to_ptr.vmem [resolvable:$true] %s33_s19  ;;  %s19_s22 = int_to_ptr.hbm [resolvable:$true] %s18_s22 }
   0x5   :  { %s518_s23 = smov 128   ;;  %s519_s24 = smov 8  }
   0x6   :  { %39 = dma.hbm_to_vmem [thread:$0]  %s32_s17, 512, %s34_s19, [#allocation6], %s518_s23, %s518_s23, %s519_s24  }
   0x7   :  { %s520_s25 = smov [#allocation2]   ;;  %s44_s1 = sshll.u32 %s621_s2, 4  ;;  %s45_s1 = int_to_ptr.hbm [resolvable:$true] %s44_s1 }
   0x8   :  { %s20_s26 = sshll.u32 %s520_s25, 4  ;;  %s521_s0 = smov [#allocation7]   ;;  %s21_s26 = int_to_ptr.vmem [resolvable:$true] %s20_s26 }
   0x9   :  { %26 = dma.hbm_to_vmem [thread:$0]  %s19_s22, 512, %s21_s26, [#allocation3], %s518_s23, %s518_s23, %s519_s24  }
   0xa   :  { %s46_s29 = sshll.u32 %s521_s0, 4  ;;  %s47_s29 = int_to_ptr.vmem [resolvable:$true] %s46_s29 }
   0xb   :  { %52 = dma.hbm_to_vmem [thread:$0]  %s45_s1, 256, %s47_s29, [#allocation6], %s518_s23, %s518_s23, %s519_s24  }
   0xc   :  { %509 = dma.done.wait [#allocation3], 512  }
   0xd   :  { %510 = vsyncadd [#allocation3], 4294966784 }
   0xe   :  { %511 = dma.done.wait [#allocation6], 768  }
   0xf   :  { %512 = vsyncadd [#allocation6], 4294966528  ;;  %v72_v0 = vld [vmem:[#allocation5 + $0x18] sm:$0xff]  ;;  %v71_v1 = vld [vmem:[#allocation5 + $0x10] sm:$0xff]  ;;  %vm73_vm0 = vcmask 261120   ;;  %vm265_vm14 = vcmask 130048  }
  0x10   :  { %98 = vmatpush.msra.mxu0 %v72_v0  ;;  %370 = vmatpush.msra.mxu3 %v72_v0  ;;  %v70_v2 = vld [vmem:[#allocation5 + $0x8] sm:$0xff]  ;;  %v69_v3 = vld [vmem:[#allocation5] sm:$0xff]  ;;  %v67_v5 = vld [vmem:[#allocation2 + $0x10] sm:$0xff]  ;;  %s326_s5 = sshll.u32 %s622_s3, 4  ;;  %s522_s6 = smov [#allocation8]   ;;  %s327_s5 = int_to_ptr.hbm [resolvable:$true] %s326_s5 }
  0x11   :  { %v65_v4 = vld [vmem:[#allocation2] sm:$0xff]  ;;  %v66_v6 = vld [vmem:[#allocation2 + $0x8] sm:$0xff]  ;;  %v68_v7 = vld [vmem:[#allocation2 + $0x18] sm:$0xff]  ;;  %s324_s7 = sshll.u32 %s522_s6, 4  ;;  %s523_s3 = smov [#allocation9]   ;;  %s325_s7 = int_to_ptr.vmem [resolvable:$true] %s324_s7 }
  0x12   :  { %99 = vmatpush.msra.mxu0 %v71_v1  ;;  %371 = vmatpush.msra.mxu3 %v71_v1  ;;  %v115_v9 = vld [vmem:[#allocation7] sm:$0xff]  ;;  %v116_v12 = vld [vmem:[#allocation7 + $0x8] sm:$0xff]  ;;  %s337_s8 = sshll.u32 %s523_s3, 4  ;;  %s339_s11 = sshll.u32 %s623_s4, 4  ;;  %s338_s8 = int_to_ptr.vmem [resolvable:$true] %s337_s8  ;;  %s340_s11 = int_to_ptr.hbm [resolvable:$true] %s339_s11 }
  0x14   :  { %100 = vmatpush.msra.mxu0 %v70_v2  ;;  %372 = vmatpush.msra.mxu3 %v70_v2  ;;  %v247_v2 = vlaneseq }
  0x16   :  { %101 = vmatpush.msra.mxu0 %v69_v3  ;;  %373 = vmatpush.msra.mxu3 %v69_v3  ;;  %v251_v3 = vand.u32 127, %v247_v2 }
  0x17   :  { %358 = vmatmul.msk.f32.vlgmr.msra.gmra.mxu0 %vm73_vm0, %v65_v4  ;;  %360 = vmatmul.msk.f32.vlgmr.msra.gmra.mxu3 %vm73_vm0, %v67_v5  ;;  %v248_v4 = vshrl.u32 %v247_v2, 7 }
  0x18   :  { %vm254_vm13 = vcmp.lt.s32.totalorder %v251_v3, 11 }
  0x19   :  { %v249_v5 = vadd.s32 8, %v248_v4 }
  0x1b   :  { %vm253_vm15 = vcmp.lt.s32.totalorder %v249_v5, 11 }
  0x1f   :  { %359 = vmatmul.msk.f32.gmra.mxu0 %vm73_vm0, %v66_v6  ;;  %361 = vmatmul.msk.f32.gmra.mxu3 %vm73_vm0, %v68_v7 }
  0x94   :  { %v103_v8 = vpop.f32.mrf.mxu0 }
  0x95   :  { %v571_v10 = vadd.f32 %v115_v9, %v103_v8 }
  0x97   :  { %121 = vst.msk [vmem:[#allocation8] sm:$0xff] %vm73_vm0, %v571_v10  ;;  %v125_v21 = vmul.f32 %v571_v10, %v571_v10 }
  0x99   :  { %v129_v23 = vsel %vm73_vm0, %v125_v21, 0.0 }
  0x9a   :  { %v109_v11 = vpop.f32.mrf.mxu3 }
  0x9b   :  { %v575_v13 = vadd.f32 %v115_v9, %v109_v11 }
  0x9c   :  { %v106_v14 = vpop.f32.mrf.mxu0 }
  0x9d   :  { %123 = vst.msk [vmem:[#allocation8 + $0x10] sm:$0xff] %vm73_vm0, %v575_v13  ;;  %v118_v15 = vadd.f32 %v116_v12, %v106_v14  ;;  %v127_v24 = vmul.f32 %v575_v13, %v575_v13 }
  0x9f   :  { %122 = vst.msk [vmem:[#allocation8 + $0x8] sm:$0xff] %vm73_vm0, %v118_v15  ;;  %v126_v16 = vmul.f32 %v118_v15, %v118_v15  ;;  %v135_v25 = vsel %vm73_vm0, %v127_v24, 0.0 }
  0xa1   :  { %v132_v17 = vsel %vm73_vm0, %v126_v16, 0.0 }
  0xa2   :  { %v112_v18 = vpop.f32.mrf.mxu3  ;;  %133 = vadd.xlane.f32.xlu1 %v132_v17 }
  0xa3   :  { %v120_v19 = vadd.f32 %v116_v12, %v112_v18 }
  0xa5   :  { %124 = vst.msk [vmem:[#allocation8 + $0x18] sm:$0xff] %vm73_vm0, %v120_v19  ;;  %v128_v20 = vmul.f32 %v120_v19, %v120_v19 }
  0xa6   :  { %332 = dma.vmem_to_hbm [thread:$0]  %s325_s7, 512, %s327_s5, [#allocation4], %s518_s23, %s518_s23, %s519_s24  }
  0xa7   :  { %v138_v22 = vsel %vm73_vm0, %v128_v20, 0.0 }
  0xa8   :  { %139 = vadd.xlane.f32.xlu0 %v138_v22 }
  0xaa   :  { %130 = vadd.xlane.f32.xlu1 %v129_v23 }
  0xb0   :  { %136 = vadd.xlane.f32.xlu0 %v135_v25 }
 0x115   :  { %v134_v26 = vpop.xlane.xlu1 %133 }
 0x116   :  { %v142_v27 = vmax.f32 %v134_v26, 1e-24 }
 0x118   :  { %381 = vrsqrt.f32 %v142_v27  ;;  %vm161_vm1 = vweird.f32 %v142_v27 }
 0x11b   :  { %v140_v28 = vpop.xlane.xlu0 %139 }
 0x11c   :  { %v144_v29 = vmax.f32 %v140_v28, 1e-24 }
 0x11d   :  { %v131_v30 = vpop.xlane.xlu1 %130 }
 0x11e   :  { %v382_v31 = vpop.eup %381  ;;  %383 = vrsqrt.f32 %v144_v29  ;;  %v141_v32 = vmax.f32 %v131_v30, 1e-24  ;;  %vm181_vm5 = vweird.f32 %v144_v29 }
 0x11f   :  { %v156_v33 = vmul.f32 %v382_v31, %v142_v27  ;;  %vm162_vm2 = vweird.f32 %v382_v31 }
 0x120   :  { %385 = vrsqrt.f32 %v141_v32  ;;  %vm163_vm3 = vmor %vm161_vm1, %vm162_vm2  ;;  %vm151_vm8 = vweird.f32 %v141_v32 }
 0x121   :  { %v157_v34 = vmul.f32 %v382_v31, %v156_v33  ;;  %vm256_vm1 = vmand %vm253_vm15, %vm254_vm13 }
 0x123   :  { %v158_v35 = vmul.f32 0.5, %v157_v34  ;;  %v137_v36 = vpop.xlane.xlu0 %136 }
 0x124   :  { %v384_v37 = vpop.eup %383  ;;  %v143_v38 = vmax.f32 %v137_v36, 1e-24 }
 0x125   :  { %v159_v39 = vsub.f32 1.5, %v158_v35  ;;  %v176_v40 = vmul.f32 %v384_v37, %v144_v29  ;;  %vm182_vm4 = vweird.f32 %v384_v37 }
 0x126   :  { %v386_v41 = vpop.eup %385  ;;  %387 = vrsqrt.f32 %v143_v38  ;;  %vm183_vm7 = vmor %vm181_vm5, %vm182_vm4  ;;  %vm171_vm11 = vweird.f32 %v143_v38 }
 0x127   :  { %v177_v42 = vmul.f32 %v384_v37, %v176_v40  ;;  %v146_v43 = vmul.f32 %v386_v41, %v141_v32  ;;  %v160_v44 = vmul.f32 %v382_v31, %v159_v39  ;;  %vm152_vm6 = vweird.f32 %v386_v41 }
 0x128   :  { %vm153_vm9 = vmor %vm151_vm8, %vm152_vm6 }
 0x129   :  { %v178_v45 = vmul.f32 0.5, %v177_v42  ;;  %v147_v46 = vmul.f32 %v386_v41, %v146_v43  ;;  %v164_v47 = vsel %vm163_vm3, %v382_v31, %v160_v44 }
 0x12a   :  { %v186_v48 = vmul.f32 %v164_v47, %v118_v15 }
 0x12b   :  { %v179_v49 = vsub.f32 1.5, %v178_v45  ;;  %v148_v50 = vmul.f32 0.5, %v147_v46 }
 0x12c   :  { %v388_v51 = vpop.eup %387  ;;  %362 = vmatpush.xpose.msk.msra.mxu1 %vm73_vm0, %v186_v48 }
 0x12d   :  { %v149_v52 = vsub.f32 1.5, %v148_v50  ;;  %v166_v53 = vmul.f32 %v388_v51, %v143_v38  ;;  %v180_v54 = vmul.f32 %v384_v37, %v179_v49  ;;  %vm172_vm10 = vweird.f32 %v388_v51 }
 0x12e   :  { %vm173_vm12 = vmor %vm171_vm11, %vm172_vm10 }
 0x12f   :  { %v167_v55 = vmul.f32 %v388_v51, %v166_v53  ;;  %v184_v56 = vsel %vm183_vm7, %v384_v37, %v180_v54  ;;  %v150_v57 = vmul.f32 %v386_v41, %v149_v52 }
 0x130   :  { %v188_v58 = vmul.f32 %v184_v56, %v120_v19 }
 0x131   :  { %v168_v59 = vmul.f32 0.5, %v167_v55  ;;  %v154_v60 = vsel %vm153_vm9, %v386_v41, %v150_v57 }
 0x132   :  { %366 = vmatpush.xpose.msk.msra.mxu2 %vm73_vm0, %v188_v58  ;;  %v185_v61 = vmul.f32 %v154_v60, %v571_v10 }
 0x133   :  { %v169_v62 = vsub.f32 1.5, %v168_v59 }
 0x134   :  { %363 = vmatpush.xpose.msk.msra.mxu1 %vm73_vm0, %v185_v61 }
 0x135   :  { %v170_v63 = vmul.f32 %v388_v51, %v169_v62 }
 0x137   :  { %364 = vmatmul.msk.f32.vlgmr.msra.gmra.mxu1 %vm73_vm0, %v185_v61  ;;  %v174_v0 = vsel %vm173_vm12, %v388_v51, %v170_v63 }
 0x138   :  { %v187_v1 = vmul.f32 %v174_v0, %v575_v13 }
 0x13a   :  { %367 = vmatpush.xpose.msk.msra.mxu2 %vm73_vm0, %v187_v1 }
 0x13d   :  { %368 = vmatmul.msk.f32.vlgmr.msra.gmra.mxu2 %vm73_vm0, %v187_v1 }
 0x13f   :  { %365 = vmatmul.msk.f32.gmra.mxu1 %vm73_vm0, %v186_v48 }
 0x145   :  { %369 = vmatmul.msk.f32.gmra.mxu2 %vm73_vm0, %v188_v58 }
 0x1b4   :  { %v212_v6 = vpop.f32.mrf.mxu1 }
 0x1b5   :  { %v261_v7 = vsel %vm254_vm13, %v212_v6, inf }
 0x1b6   :  { %v266_v8 = vsel %vm265_vm14, %v261_v7, inf }
 0x1b7   :  { %267 = vmin.xlane.f32.xlu2 %v266_v8 }
 0x1bc   :  { %v215_v9 = vpop.f32.mrf.mxu1 }
 0x1bd   :  { %v262_v10 = vsel %vm256_vm1, %v215_v9, inf }
 0x1be   :  { %v269_v11 = vsel %vm265_vm14, %v262_v10, inf }
 0x1bf   :  { %270 = vmin.xlane.f32.xlu2 %v269_v11 }
 0x1c0   :  { %v241_v12 = vpop.f32.mrf.mxu2 }
 0x1c1   :  { %v263_v13 = vsel %vm254_vm13, %v241_v12, inf }
 0x1c2   :  { %v272_v14 = vsel %vm265_vm14, %v263_v13, inf }
 0x1c3   :  { %273 = vmin.xlane.f32.xlu0 %v272_v14 }
 0x1c8   :  { %v244_v15 = vpop.f32.mrf.mxu2 }
 0x1c9   :  { %v264_v16 = vsel %vm256_vm1, %v244_v15, inf }
 0x1ca   :  { %v275_v17 = vsel %vm265_vm14, %v264_v16, inf }
 0x1cb   :  { %276 = vmin.xlane.f32.xlu1 %v275_v17 }
 0x22a   :  { %v268_v18 = vpop.xlane.xlu2 %267 }
 0x232   :  { %v271_v19 = vpop.xlane.xlu2 %270 }
 0x233   :  { %v278_v20 = vmin.f32 %v268_v18, %v271_v19 }
 0x235   :  { %v279_v21 = vrot.slane %v278_v20, 4 }
 0x236   :  { %v274_v26 = vpop.xlane.xlu0 %273 }
 0x237   :  { %v280_v22 = vmin.f32 %v278_v20, %v279_v21 }
 0x239   :  { %v281_v23 = vrot.slane %v280_v22, 2 }
 0x23b   :  { %v282_v24 = vmin.f32 %v280_v22, %v281_v23 }
 0x23d   :  { %v283_v25 = vrot.slane %v282_v24, 1 }
 0x23e   :  { %v277_v27 = vpop.xlane.xlu1 %276 }
 0x23f   :  { %v284_v28 = vmin.f32 %v282_v24, %v283_v25  ;;  %v285_v29 = vmin.f32 %v274_v26, %v277_v27 }
 0x241   :  { %vm294_vm0 = vcmp.gt.f32.partialorder %v284_v28, 0.4  ;;  %vm296_vm2 = vcmp.lt.f32.partialorder %v284_v28, 0.6  ;;  %v300_v30 = vadd.f32 0.1, %v284_v28 }
 0x242   :  { %v302_v31 = vadd.f32 0.03, %v284_v28  ;;  %v286_v32 = vrot.slane %v285_v29, 4  ;;  %vm298_vm3 = vmand %vm294_vm0, %vm296_vm2  ;;  %vm292_vm4 = vcmp.lt.f32.partialorder %v284_v28, 0.4 }
 0x244   :  { %v287_v33 = vmin.f32 %v285_v29, %v286_v32  ;;  %v304_v34 = vsel %vm298_vm3, %v300_v30, %v302_v31 }
 0x245   :  { %v306_v35 = vsel %vm292_vm4, 0.4, %v304_v34 }
 0x246   :  { %v288_v36 = vrot.slane %v287_v33, 2  ;;  %vm308_vm5 = vcmp.lt.f32.partialorder %v212_v6, %v306_v35  ;;  %vm309_vm6 = vcmp.lt.f32.partialorder %v215_v9, %v306_v35 }
 0x247   :  { %v312_v37 = vsel %vm308_vm5, 0.0, %v212_v6  ;;  %v313_v38 = vsel %vm309_vm6, 0.0, %v215_v9 }
 0x248   :  { %v289_v39 = vmin.f32 %v287_v33, %v288_v36  ;;  %316 = vst.msk [vmem:[#allocation9] sm:$0xff] %vm265_vm14, %v312_v37 }
 0x249   :  { %317 = vst.msk [vmem:[#allocation9 + $0x8] sm:$0xff] %vm265_vm14, %v313_v38 }
 0x24a   :  { %v290_v40 = vrot.slane %v289_v39, 1 }
 0x24c   :  { %v291_v41 = vmin.f32 %v289_v39, %v290_v40 }
 0x24e   :  { %vm295_vm7 = vcmp.gt.f32.partialorder %v291_v41, 0.4  ;;  %vm297_vm8 = vcmp.lt.f32.partialorder %v291_v41, 0.6  ;;  %v301_v42 = vadd.f32 0.1, %v291_v41 }
 0x24f   :  { %v303_v43 = vadd.f32 0.03, %v291_v41  ;;  %vm299_vm9 = vmand %vm295_vm7, %vm297_vm8  ;;  %vm293_vm10 = vcmp.lt.f32.partialorder %v291_v41, 0.4 }
 0x251   :  { %v305_v44 = vsel %vm299_vm9, %v301_v42, %v303_v43 }
 0x252   :  { %v307_v45 = vsel %vm293_vm10, 0.4, %v305_v44 }
 0x253   :  { %vm310_vm11 = vcmp.lt.f32.partialorder %v241_v12, %v307_v45  ;;  %vm311_vm12 = vcmp.lt.f32.partialorder %v244_v15, %v307_v45 }
 0x254   :  { %v314_v46 = vsel %vm310_vm11, 0.0, %v241_v12  ;;  %v315_v47 = vsel %vm311_vm12, 0.0, %v244_v15 }
 0x255   :  { %318 = vst.msk [vmem:[#allocation9 + $0x10] sm:$0xff] %vm265_vm14, %v314_v46 }
 0x256   :  { %319 = vst.msk [vmem:[#allocation9 + $0x18] sm:$0xff] %vm265_vm14, %v315_v47 }
 0x257   :  { %345 = dma.vmem_to_hbm [thread:$0]  %s338_s8, 512, %s340_s11, [#allocation10], %s518_s23, %s518_s23, %s519_s24  }
 0x258   :  { %513 = dma.done.wait [#allocation4], 512  }
 0x259   :  { %514 = vsyncadd [#allocation4], 4294966784 }
 0x25a   :  { %515 = dma.done.wait [#allocation10], 512  }
 0x25b   :  { %516 = vsyncadd [#allocation10], 4294966784 }
 0x25c   :  { %354 = vsyncpa [#allocation3], 1 }
 0x25d   :  { %355 = vsyncpa [#allocation6], 1 }
 0x25e   :  { %356 = vsyncpa [#allocation4], 1 }
 0x25f   :  { %357 = vsyncpa [#allocation10], 1 }

</bundles_post_ra>
